<compile_context>
chip_gen: v7x
topology: tpu7x:2x2x1
jax: 0.10.0
libtpu: 0.0.40
codegen_flags: <defaults>
</compile_context>

<pallas_src>
import math
import jax
import jax.numpy as jnp
from jax.experimental import pallas as pl
from jax.experimental.pallas import tpu as pltpu  # noqa: F401  (not needed at this size)

# ---------------- model hyper-parameters (small, consistent with the module) ----------
D_MODEL = 32
NHEAD = 4
HEAD_DIM = D_MODEL // NHEAD
DIM_FF = 64
SEQ = 8
BATCH = 2
N_TOK = SEQ * BATCH              # 16 token rows (row t = s*B + b)
N_ROWS = NHEAD * N_TOK           # 64 (head, token) rows for the fused attention
LN_EPS = 1e-5
NEG_INF = -1e9

assert NHEAD * HEAD_DIM == D_MODEL
assert N_TOK & (N_TOK - 1) == 0, "N_TOK must be a power of two for bitwise mask math"
assert BATCH & (BATCH - 1) == 0, "BATCH must be a power of two for bitwise mask math"
TOK_BITS = N_TOK.bit_length() - 1          # row // N_TOK  ==  row >> TOK_BITS

# ---------------- single packed parameter slab (one DMA) -------------------------------
SLAB_COLS = 128                  # lane-padded; each operand is padded to 128 lanes anyway
R_WQKV = 0                       # rows [  0: 32)  W_qkv (32, 96)   (Q-scale pre-folded)
R_WO = D_MODEL                   # rows [ 32: 64)  W_o   (32, 32)
R_W1 = 2 * D_MODEL               # rows [ 64: 96)  W_1   (32, 64)
R_W2 = 3 * D_MODEL               # rows [ 96:160)  W_2   (64, 32)
R_VEC = 3 * D_MODEL + DIM_FF     # rows [160:168)  bias / LayerNorm vectors (8 rows)
SLAB_ROWS = R_VEC + 8            # 168 (multiple of 8)


def pack_params(params):
    """Pack all weights/vectors into one (168,128) f32 slab. Run ONCE, outside the call path."""
    scale = 1.0 / math.sqrt(HEAD_DIM)
    w_qkv = jnp.concatenate([params["wq"] * scale, params["wk"], params["wv"]], axis=1)  # (32,96)
    b_qkv = jnp.concatenate([params["bq"] * scale, params["bk"], params["bv"]], axis=1)  # (1,96)

    slab = jnp.zeros((SLAB_ROWS, SLAB_COLS), jnp.float32)

    def put(s, row, block):
        r, c = block.shape
        return s.at[row:row + r, 0:c].set(block)

    slab = put(slab, R_WQKV, w_qkv)
    slab = put(slab, R_WO, params["wo"])
    slab = put(slab, R_W1, params["w1"])
    slab = put(slab, R_W2, params["w2"])
    vec_rows = [b_qkv, params["b1"], params["bo"], params["b2"],
                params["g1"], params["be1"], params["g2"], params["be2"]]
    for i, v in enumerate(vec_rows):
        slab = put(slab, R_VEC + i, v)
    return slab


# ---------------- Pallas kernel: whole batch, one step ---------------------------------
def encoder_layer_kernel(x_ref, pad_ref, slab_ref, o_ref):
    f32 = jnp.float32
    x = x_ref[...]                                           # (N_TOK, D)

    # ---- carve parameters out of the single slab (static slices: zero-cost views) ----
    w_qkv = slab_ref[R_WQKV:R_WQKV + D_MODEL, 0:3 * D_MODEL]        # (32, 96)
    w_o = slab_ref[R_WO:R_WO + D_MODEL, 0:D_MODEL]                  # (32, 32)
    w_1 = slab_ref[R_W1:R_W1 + D_MODEL, 0:DIM_FF]                   # (32, 64)
    w_2 = slab_ref[R_W2:R_W2 + DIM_FF, 0:D_MODEL]                   # (64, 32)
    b_qkv = slab_ref[R_VEC + 0:R_VEC + 1, 0:3 * D_MODEL]
    b_1 = slab_ref[R_VEC + 1:R_VEC + 2, 0:DIM_FF]
    b_o = slab_ref[R_VEC + 2:R_VEC + 3, 0:D_MODEL]
    b_2 = slab_ref[R_VEC + 3:R_VEC + 4, 0:D_MODEL]
    g_1 = slab_ref[R_VEC + 4:R_VEC + 5, 0:D_MODEL]
    be_1 = slab_ref[R_VEC + 5:R_VEC + 6, 0:D_MODEL]
    g_2 = slab_ref[R_VEC + 6:R_VEC + 7, 0:D_MODEL]
    be_2 = slab_ref[R_VEC + 7:R_VEC + 8, 0:D_MODEL]

    # ---- fused QKV projection (softmax scale already folded into the Q columns) ----
    qkv = jnp.dot(x, w_qkv, preferred_element_type=f32) + b_qkv     # (N_TOK, 3D)

    # ---- stack heads along rows: row r = head*N_TOK + token ----
    def heads(base):
        return jnp.concatenate(
            [qkv[:, base + h * HEAD_DIM: base + (h + 1) * HEAD_DIM] for h in range(NHEAD)],
            axis=0)                                                  # (N_ROWS, HEAD_DIM)

    qh = heads(0)
    kh = heads(D_MODEL)
    vh = heads(2 * D_MODEL)

    # ---- ONE score matmul + ONE softmax covers all heads and batch elements ----
    s = jax.lax.dot_general(qh, kh, (((1,), (1,)), ((), ())),
                            preferred_element_type=f32)              # (N_ROWS, N_ROWS)

    # build the block-diagonal (head, batch) mask in-kernel: free VPU compares
    row = jax.lax.broadcasted_iota(jnp.int32, (N_ROWS, N_ROWS), 0)
    col = jax.lax.broadcasted_iota(jnp.int32, (N_ROWS, N_ROWS), 1)
    same_head = (row >> TOK_BITS) == (col >> TOK_BITS)               # head  = r // N_TOK
    same_batch = (row & (BATCH - 1)) == (col & (BATCH - 1))          # batch = token % B
    s = jnp.where(same_head & same_batch, s, NEG_INF) + pad_ref[...]  # + key-pad columns

    s = s - jnp.max(s, axis=-1, keepdims=True)
    p = jnp.exp(s)
    p = p / jnp.sum(p, axis=-1, keepdims=True)                       # exact division

    o_h = jnp.dot(p, vh, preferred_element_type=f32)                 # (N_ROWS, HEAD_DIM)
    attn = jnp.concatenate(
        [o_h[h * N_TOK:(h + 1) * N_TOK, :] for h in range(NHEAD)], axis=1)   # (N_TOK, D)
    attn = jnp.dot(attn, w_o, preferred_element_type=f32) + b_o

    # ---- residual + LayerNorm 1 (post-norm, biased variance like PyTorch) ----
    y = x + attn
    mu = jnp.mean(y, axis=-1, keepdims=True)
    var = jnp.mean((y - mu) ** 2, axis=-1, keepdims=True)
    y = (y - mu) * jax.lax.rsqrt(var + LN_EPS) * g_1 + be_1

    # ---- feed-forward (linear -> ReLU -> linear) ----
    h1 = jnp.maximum(jnp.dot(y, w_1, preferred_element_type=f32) + b_1, 0.0)
    h2 = jnp.dot(h1, w_2, preferred_element_type=f32) + b_2

    # ---- residual + LayerNorm 2 ----
    z = y + h2
    mu2 = jnp.mean(z, axis=-1, keepdims=True)
    var2 = jnp.mean((z - mu2) ** 2, axis=-1, keepdims=True)
    z = (z - mu2) * jax.lax.rsqrt(var2 + LN_EPS) * g_2 + be_2

    o_ref[...] = z.astype(o_ref.dtype)


# ---------------- wrapper (jit-ed: one dispatch end-to-end) -----------------------------
@jax.jit
def custom_encoder_layer(src, key_padding_mask, slab):
    """src: (S, B, D) f32, key_padding_mask: (B, S) bool (True = pad), slab: packed params."""
    S, B, D = src.shape
    # (S, B, D) -> (S*B, D) is a free, contiguous reshape; row t = s*B + b.
    x = src.reshape(S * B, D)

    # tiny (1, N_ROWS) additive key-padding row (column c -> key token c % N_TOK)
    tok_pad = key_padding_mask.T.reshape(S * B)                      # token t = s*B + b
    pad_cols = jnp.where(jnp.tile(tok_pad, NHEAD), NEG_INF, 0.0)
    pad_cols = pad_cols.astype(jnp.float32).reshape(1, NHEAD * S * B)

    out = pl.pallas_call(
        encoder_layer_kernel,
        out_shape=jax.ShapeDtypeStruct((S * B, D), jnp.float32),
        input_output_aliases={0: 0},          # x and out are both (16, 32) f32
    )(x, pad_cols, slab)

    return out.reshape(S, B, D)                                      # free reshape back


# ---------------- pure-JAX reference (same math) for verification -----------------------
def reference_encoder_layer(src, key_padding_mask, params):
    S, B, D = src.shape
    x = jnp.transpose(src, (1, 0, 2))                                # (B, S, D)
    add_mask = jnp.where(key_padding_mask, NEG_INF, 0.0)[:, None, None, :]   # (B,1,1,S)

    q = x @ params["wq"] + params["bq"]
    k = x @ params["wk"] + params["bk"]
    v = x @ params["wv"] + params["bv"]
    q = q.reshape(B, S, NHEAD, HEAD_DIM).transpose(0, 2, 1, 3)
    k = k.reshape(B, S, NHEAD, HEAD_DIM).transpose(0, 2, 1, 3)
    v = v.reshape(B, S, NHEAD, HEAD_DIM).transpose(0, 2, 1, 3)
    s = (q / math.sqrt(HEAD_DIM)) @ k.transpose(0, 1, 3, 2) + add_mask
    p = jax.nn.softmax(s, axis=-1)
    a = (p @ v).transpose(0, 2, 1, 3).reshape(B, S, D)
    a = a @ params["wo"] + params["bo"]

    def ln(t, g, b):
        mu = jnp.mean(t, axis=-1, keepdims=True)
        var = jnp.mean((t - mu) ** 2, axis=-1, keepdims=True)
        return (t - mu) * jax.lax.rsqrt(var + LN_EPS) * g + b

    y = ln(x + a, params["g1"], params["be1"])
    h = jnp.maximum(y @ params["w1"] + params["b1"], 0.0) @ params["w2"] + params["b2"]
    z = ln(y + h, params["g2"], params["be2"])
    return jnp.transpose(z, (1, 0, 2))


# ---------------- deterministic parameter init ------------------------------------------
def init_params(key):
    ks = jax.random.split(key, 8)

    def lin(k, fan_in, shape):
        bound = 1.0 / math.sqrt(fan_in)
        return jax.random.uniform(k, shape, jnp.float32, -bound, bound)

    return {
        "wq": lin(ks[0], D_MODEL, (D_MODEL, D_MODEL)), "bq": jnp.zeros((1, D_MODEL), jnp.float32),
        "wk": lin(ks[1], D_MODEL, (D_MODEL, D_MODEL)), "bk": jnp.zeros((1, D_MODEL), jnp.float32),
        "wv": lin(ks[2], D_MODEL, (D_MODEL, D_MODEL)), "bv": jnp.zeros((1, D_MODEL), jnp.float32),
        "wo": lin(ks[3], D_MODEL, (D_MODEL, D_MODEL)), "bo": jnp.zeros((1, D_MODEL), jnp.float32),
        "w1": lin(ks[4], D_MODEL, (D_MODEL, DIM_FF)),  "b1": lin(ks[5], D_MODEL, (1, DIM_FF)),
        "w2": lin(ks[6], DIM_FF, (DIM_FF, D_MODEL)),   "b2": lin(ks[7], DIM_FF, (1, D_MODEL)),
        "g1": jnp.ones((1, D_MODEL), jnp.float32),  "be1": jnp.zeros((1, D_MODEL), jnp.float32),
        "g2": jnp.ones((1, D_MODEL), jnp.float32),  "be2": jnp.zeros((1, D_MODEL), jnp.float32),
    }


if __name__ == "__main__":
    key = jax.random.PRNGKey(0)
    k_src, k_par = jax.random.split(key)
    src = jax.random.normal(k_src, (SEQ, BATCH, D_MODEL), jnp.float32)   # (S, B, D)
    # padding mask: last 2 tokens of batch element 1 are padding
    key_padding_mask = jnp.zeros((BATCH, SEQ), dtype=bool).at[1, -2:].set(True)
    params = init_params(k_par)

    slab = pack_params(params)           # one-time parameter packing, outside the call path

    out = custom_encoder_layer(src, key_padding_mask, slab)
    out = jax.block_until_ready(out)

    ref = reference_encoder_layer(src, key_padding_mask, params)
    assert out.shape == (SEQ, BATCH, D_MODEL)
    # tolerance accommodates default (bf16-pass) MXU precision differing in grouping
    # between the fused kernel and the XLA reference
    assert jnp.allclose(out, ref, atol=5e-3, rtol=5e-3), "mismatch vs pure-JAX reference"

    print("KERNEL_OK")
</pallas_src>

<mosaic_0001>
module attributes {stable_mosaic.version = 11 : i64} {
  func.func @encoder_layer_kernel(%arg0: memref<16x32xf32, #tpu.memory_space<vmem>>, %arg1: memref<1x64xf32, #tpu.memory_space<vmem>>, %arg2: memref<168x128xf32, #tpu.memory_space<vmem>>, %arg3: memref<16x32xf32, #tpu.memory_space<vmem>>) attributes {dimension_semantics = [], scalar_prefetch = 0 : i64, scratch_operands = 0 : i64, tpu.core_type = #tpu.core_type<tc>} {
    %c0 = arith.constant 0 : index
    %c0_0 = arith.constant 0 : index
    %0 = vector.load %arg0[%c0, %c0_0] : memref<16x32xf32, #tpu.memory_space<vmem>>, vector<16x32xf32>
    %c0_1 = arith.constant 0 : index
    %c0_2 = arith.constant 0 : index
    %1 = vector.load %arg2[%c0_1, %c0_2] : memref<168x128xf32, #tpu.memory_space<vmem>>, vector<32x96xf32>
    %c32 = arith.constant 32 : index
    %c0_3 = arith.constant 0 : index
    %2 = vector.load %arg2[%c32, %c0_3] : memref<168x128xf32, #tpu.memory_space<vmem>>, vector<32x32xf32>
    %c64 = arith.constant 64 : index
    %c0_4 = arith.constant 0 : index
    %3 = vector.load %arg2[%c64, %c0_4] : memref<168x128xf32, #tpu.memory_space<vmem>>, vector<32x64xf32>
    %c96 = arith.constant 96 : index
    %c0_5 = arith.constant 0 : index
    %4 = vector.load %arg2[%c96, %c0_5] : memref<168x128xf32, #tpu.memory_space<vmem>>, vector<64x32xf32>
    %c160 = arith.constant 160 : index
    %c0_6 = arith.constant 0 : index
    %5 = vector.load %arg2[%c160, %c0_6] : memref<168x128xf32, #tpu.memory_space<vmem>>, vector<1x96xf32>
    %c161 = arith.constant 161 : index
    %c0_7 = arith.constant 0 : index
    %6 = vector.load %arg2[%c161, %c0_7] : memref<168x128xf32, #tpu.memory_space<vmem>>, vector<1x64xf32>
    %c162 = arith.constant 162 : index
    %c0_8 = arith.constant 0 : index
    %7 = vector.load %arg2[%c162, %c0_8] : memref<168x128xf32, #tpu.memory_space<vmem>>, vector<1x32xf32>
    %c163 = arith.constant 163 : index
    %c0_9 = arith.constant 0 : index
    %8 = vector.load %arg2[%c163, %c0_9] : memref<168x128xf32, #tpu.memory_space<vmem>>, vector<1x32xf32>
    %c164 = arith.constant 164 : index
    %c0_10 = arith.constant 0 : index
    %9 = vector.load %arg2[%c164, %c0_10] : memref<168x128xf32, #tpu.memory_space<vmem>>, vector<1x32xf32>
    %c165 = arith.constant 165 : index
    %c0_11 = arith.constant 0 : index
    %10 = vector.load %arg2[%c165, %c0_11] : memref<168x128xf32, #tpu.memory_space<vmem>>, vector<1x32xf32>
    %c166 = arith.constant 166 : index
    %c0_12 = arith.constant 0 : index
    %11 = vector.load %arg2[%c166, %c0_12] : memref<168x128xf32, #tpu.memory_space<vmem>>, vector<1x32xf32>
    %c167 = arith.constant 167 : index
    %c0_13 = arith.constant 0 : index
    %12 = vector.load %arg2[%c167, %c0_13] : memref<168x128xf32, #tpu.memory_space<vmem>>, vector<1x32xf32>
    %cst = arith.constant dense<0.000000e+00> : vector<16x96xf32>
    %13 = tpu.matmul %0, %1, %cst {dimension_numbers = #tpu.dot_dimension_numbers<[1], [0], [0], [1], [0, 0, 1, 1], [], []>} : vector<16x32xf32>, vector<32x96xf32>, vector<16x96xf32> -> vector<16x96xf32>
    %14 = vector.broadcast %5 : vector<1x96xf32> to vector<16x96xf32>
    %15 = arith.addf %13, %14 : vector<16x96xf32>
    %16 = vector.extract_strided_slice %15 {offsets = [0, 0], sizes = [16, 8], strides = [1, 1]} : vector<16x96xf32> to vector<16x8xf32>
    %17 = vector.extract_strided_slice %15 {offsets = [0, 8], sizes = [16, 8], strides = [1, 1]} : vector<16x96xf32> to vector<16x8xf32>
    %18 = vector.extract_strided_slice %15 {offsets = [0, 16], sizes = [16, 8], strides = [1, 1]} : vector<16x96xf32> to vector<16x8xf32>
    %19 = vector.extract_strided_slice %15 {offsets = [0, 24], sizes = [16, 8], strides = [1, 1]} : vector<16x96xf32> to vector<16x8xf32>
    %20 = tpu.concatenate %16, %17, %18, %19 in 0 : vector<16x8xf32>, vector<16x8xf32>, vector<16x8xf32>, vector<16x8xf32> -> vector<64x8xf32>
    %21 = vector.extract_strided_slice %15 {offsets = [0, 32], sizes = [16, 8], strides = [1, 1]} : vector<16x96xf32> to vector<16x8xf32>
    %22 = vector.extract_strided_slice %15 {offsets = [0, 40], sizes = [16, 8], strides = [1, 1]} : vector<16x96xf32> to vector<16x8xf32>
    %23 = vector.extract_strided_slice %15 {offsets = [0, 48], sizes = [16, 8], strides = [1, 1]} : vector<16x96xf32> to vector<16x8xf32>
    %24 = vector.extract_strided_slice %15 {offsets = [0, 56], sizes = [16, 8], strides = [1, 1]} : vector<16x96xf32> to vector<16x8xf32>
    %25 = tpu.concatenate %21, %22, %23, %24 in 0 : vector<16x8xf32>, vector<16x8xf32>, vector<16x8xf32>, vector<16x8xf32> -> vector<64x8xf32>
    %26 = vector.extract_strided_slice %15 {offsets = [0, 64], sizes = [16, 8], strides = [1, 1]} : vector<16x96xf32> to vector<16x8xf32>
    %27 = vector.extract_strided_slice %15 {offsets = [0, 72], sizes = [16, 8], strides = [1, 1]} : vector<16x96xf32> to vector<16x8xf32>
    %28 = vector.extract_strided_slice %15 {offsets = [0, 80], sizes = [16, 8], strides = [1, 1]} : vector<16x96xf32> to vector<16x8xf32>
    %29 = vector.extract_strided_slice %15 {offsets = [0, 88], sizes = [16, 8], strides = [1, 1]} : vector<16x96xf32> to vector<16x8xf32>
    %30 = tpu.concatenate %26, %27, %28, %29 in 0 : vector<16x8xf32>, vector<16x8xf32>, vector<16x8xf32>, vector<16x8xf32> -> vector<64x8xf32>
    %cst_14 = arith.constant dense<0.000000e+00> : vector<64x64xf32>
    %31 = tpu.matmul %20, %25, %cst_14 {dimension_numbers = #tpu.dot_dimension_numbers<[1], [1], [0], [0], [0, 0, 1, 0], [], []>} : vector<64x8xf32>, vector<64x8xf32>, vector<64x64xf32> -> vector<64x64xf32>
    %32 = tpu.iota {dimensions = array<i32: 0>} : vector<64x64xi32>
    %33 = tpu.iota {dimensions = array<i32: 1>} : vector<64x64xi32>
    %c4_i32 = arith.constant 4 : i32
    %34 = vector.broadcast %c4_i32 : i32 to vector<64x64xi32>
    %35 = arith.shrsi %32, %34 : vector<64x64xi32>
    %c4_i32_15 = arith.constant 4 : i32
    %36 = vector.broadcast %c4_i32_15 : i32 to vector<64x64xi32>
    %37 = arith.shrsi %33, %36 : vector<64x64xi32>
    %38 = arith.cmpi eq, %35, %37 : vector<64x64xi32>
    %c1_i32 = arith.constant 1 : i32
    %39 = vector.broadcast %c1_i32 : i32 to vector<64x64xi32>
    %40 = arith.andi %32, %39 : vector<64x64xi32>
    %c1_i32_16 = arith.constant 1 : i32
    %41 = vector.broadcast %c1_i32_16 : i32 to vector<64x64xi32>
    %42 = arith.andi %33, %41 : vector<64x64xi32>
    %43 = arith.cmpi eq, %40, %42 : vector<64x64xi32>
    %44 = arith.andi %38, %43 : vector<64x64xi1>
    %cst_17 = arith.constant -1.000000e+09 : f32
    %45 = vector.broadcast %cst_17 : f32 to vector<64x64xf32>
    %46 = arith.select %44, %31, %45 : vector<64x64xi1>, vector<64x64xf32>
    %c0_18 = arith.constant 0 : index
    %c0_19 = arith.constant 0 : index
    %47 = vector.load %arg1[%c0_18, %c0_19] : memref<1x64xf32, #tpu.memory_space<vmem>>, vector<1x64xf32>
    %48 = vector.broadcast %47 : vector<1x64xf32> to vector<64x64xf32>
    %49 = arith.addf %46, %48 : vector<64x64xf32>
    %cst_20 = arith.constant dense<0xFF800000> : vector<64xf32>
    %50 = vector.multi_reduction <maximumf>, %49, %cst_20 [1] : vector<64x64xf32> to vector<64xf32>
    %51 = vector.shape_cast %50 : vector<64xf32> to vector<64x1xf32>
    %52 = vector.broadcast %51 : vector<64x1xf32> to vector<64x64xf32>
    %53 = arith.subf %49, %52 : vector<64x64xf32>
    %54 = math.exp %53 : vector<64x64xf32>
    %cst_21 = arith.constant dense<0.000000e+00> : vector<64xf32>
    %55 = vector.multi_reduction <add>, %54, %cst_21 [1] : vector<64x64xf32> to vector<64xf32>
    %56 = vector.shape_cast %55 : vector<64xf32> to vector<64x1xf32>
    %57 = vector.broadcast %56 : vector<64x1xf32> to vector<64x64xf32>
    %58 = arith.divf %54, %57 : vector<64x64xf32>
    %cst_22 = arith.constant dense<0.000000e+00> : vector<64x8xf32>
    %59 = tpu.matmul %58, %30, %cst_22 {dimension_numbers = #tpu.dot_dimension_numbers<[1], [0], [0], [1], [0, 0, 1, 1], [], []>} : vector<64x64xf32>, vector<64x8xf32>, vector<64x8xf32> -> vector<64x8xf32>
    %60 = vector.extract_strided_slice %59 {offsets = [0, 0], sizes = [16, 8], strides = [1, 1]} : vector<64x8xf32> to vector<16x8xf32>
    %61 = vector.extract_strided_slice %59 {offsets = [16, 0], sizes = [16, 8], strides = [1, 1]} : vector<64x8xf32> to vector<16x8xf32>
    %62 = vector.extract_strided_slice %59 {offsets = [32, 0], sizes = [16, 8], strides = [1, 1]} : vector<64x8xf32> to vector<16x8xf32>
    %63 = vector.extract_strided_slice %59 {offsets = [48, 0], sizes = [16, 8], strides = [1, 1]} : vector<64x8xf32> to vector<16x8xf32>
    %64 = tpu.concatenate %60, %61, %62, %63 in 1 : vector<16x8xf32>, vector<16x8xf32>, vector<16x8xf32>, vector<16x8xf32> -> vector<16x32xf32>
    %cst_23 = arith.constant dense<0.000000e+00> : vector<16x32xf32>
    %65 = tpu.matmul %64, %2, %cst_23 {dimension_numbers = #tpu.dot_dimension_numbers<[1], [0], [0], [1], [0, 0, 1, 1], [], []>} : vector<16x32xf32>, vector<32x32xf32>, vector<16x32xf32> -> vector<16x32xf32>
    %66 = vector.broadcast %7 : vector<1x32xf32> to vector<16x32xf32>
    %67 = arith.addf %65, %66 : vector<16x32xf32>
    %68 = arith.addf %0, %67 : vector<16x32xf32>
    %cst_24 = arith.constant dense<0.000000e+00> : vector<16xf32>
    %69 = vector.multi_reduction <add>, %68, %cst_24 [1] : vector<16x32xf32> to vector<16xf32>
    %70 = vector.shape_cast %69 : vector<16xf32> to vector<16x1xf32>
    %cst_25 = arith.constant 3.200000e+01 : f32
    %71 = vector.broadcast %cst_25 : f32 to vector<16x1xf32>
    %72 = arith.divf %70, %71 : vector<16x1xf32>
    %73 = vector.broadcast %72 : vector<16x1xf32> to vector<16x32xf32>
    %74 = arith.subf %68, %73 : vector<16x32xf32>
    %75 = arith.mulf %74, %74 : vector<16x32xf32>
    %cst_26 = arith.constant dense<0.000000e+00> : vector<16xf32>
    %76 = vector.multi_reduction <add>, %75, %cst_26 [1] : vector<16x32xf32> to vector<16xf32>
    %77 = vector.shape_cast %76 : vector<16xf32> to vector<16x1xf32>
    %cst_27 = arith.constant 3.200000e+01 : f32
    %78 = vector.broadcast %cst_27 : f32 to vector<16x1xf32>
    %79 = arith.divf %77, %78 : vector<16x1xf32>
    %80 = vector.broadcast %72 : vector<16x1xf32> to vector<16x32xf32>
    %81 = arith.subf %68, %80 : vector<16x32xf32>
    %cst_28 = arith.constant 9.99999974E-6 : f32
    %82 = vector.broadcast %cst_28 : f32 to vector<16x1xf32>
    %83 = arith.addf %79, %82 : vector<16x1xf32>
    %84 = math.rsqrt %83 : vector<16x1xf32>
    %85 = vector.broadcast %84 : vector<16x1xf32> to vector<16x32xf32>
    %86 = arith.mulf %81, %85 : vector<16x32xf32>
    %87 = vector.broadcast %9 : vector<1x32xf32> to vector<16x32xf32>
    %88 = arith.mulf %86, %87 : vector<16x32xf32>
    %89 = vector.broadcast %10 : vector<1x32xf32> to vector<16x32xf32>
    %90 = arith.addf %88, %89 : vector<16x32xf32>
    %cst_29 = arith.constant dense<0.000000e+00> : vector<16x64xf32>
    %91 = tpu.matmul %90, %3, %cst_29 {dimension_numbers = #tpu.dot_dimension_numbers<[1], [0], [0], [1], [0, 0, 1, 1], [], []>} : vector<16x32xf32>, vector<32x64xf32>, vector<16x64xf32> -> vector<16x64xf32>
    %92 = vector.broadcast %6 : vector<1x64xf32> to vector<16x64xf32>
    %93 = arith.addf %91, %92 : vector<16x64xf32>
    %cst_30 = arith.constant 0.000000e+00 : f32
    %94 = vector.broadcast %cst_30 : f32 to vector<16x64xf32>
    %95 = arith.maximumf %93, %94 : vector<16x64xf32>
    %cst_31 = arith.constant dense<0.000000e+00> : vector<16x32xf32>
    %96 = tpu.matmul %95, %4, %cst_31 {dimension_numbers = #tpu.dot_dimension_numbers<[1], [0], [0], [1], [0, 0, 1, 1], [], []>} : vector<16x64xf32>, vector<64x32xf32>, vector<16x32xf32> -> vector<16x32xf32>
    %97 = vector.broadcast %8 : vector<1x32xf32> to vector<16x32xf32>
    %98 = arith.addf %96, %97 : vector<16x32xf32>
    %99 = arith.addf %90, %98 : vector<16x32xf32>
    %cst_32 = arith.constant dense<0.000000e+00> : vector<16xf32>
    %100 = vector.multi_reduction <add>, %99, %cst_32 [1] : vector<16x32xf32> to vector<16xf32>
    %101 = vector.shape_cast %100 : vector<16xf32> to vector<16x1xf32>
    %cst_33 = arith.constant 3.200000e+01 : f32
    %102 = vector.broadcast %cst_33 : f32 to vector<16x1xf32>
    %103 = arith.divf %101, %102 : vector<16x1xf32>
    %104 = vector.broadcast %103 : vector<16x1xf32> to vector<16x32xf32>
    %105 = arith.subf %99, %104 : vector<16x32xf32>
    %106 = arith.mulf %105, %105 : vector<16x32xf32>
    %cst_34 = arith.constant dense<0.000000e+00> : vector<16xf32>
    %107 = vector.multi_reduction <add>, %106, %cst_34 [1] : vector<16x32xf32> to vector<16xf32>
    %108 = vector.shape_cast %107 : vector<16xf32> to vector<16x1xf32>
    %cst_35 = arith.constant 3.200000e+01 : f32
    %109 = vector.broadcast %cst_35 : f32 to vector<16x1xf32>
    %110 = arith.divf %108, %109 : vector<16x1xf32>
    %111 = vector.broadcast %103 : vector<16x1xf32> to vector<16x32xf32>
    %112 = arith.subf %99, %111 : vector<16x32xf32>
    %cst_36 = arith.constant 9.99999974E-6 : f32
    %113 = vector.broadcast %cst_36 : f32 to vector<16x1xf32>
    %114 = arith.addf %110, %113 : vector<16x1xf32>
    %115 = math.rsqrt %114 : vector<16x1xf32>
    %116 = vector.broadcast %115 : vector<16x1xf32> to vector<16x32xf32>
    %117 = arith.mulf %112, %116 : vector<16x32xf32>
    %118 = vector.broadcast %11 : vector<1x32xf32> to vector<16x32xf32>
    %119 = arith.mulf %117, %118 : vector<16x32xf32>
    %120 = vector.broadcast %12 : vector<1x32xf32> to vector<16x32xf32>
    %121 = arith.addf %119, %120 : vector<16x32xf32>
    %c0_37 = arith.constant 0 : index
    %c0_38 = arith.constant 0 : index
    %122 = vector.load %arg3[%c0_37, %c0_38] : memref<16x32xf32, #tpu.memory_space<vmem>>, vector<16x32xf32>
    tpu.vector_store %arg3[%c0_37, %c0_38], %121 {strides = array<i32>} : memref<16x32xf32, #tpu.memory_space<vmem>>, vector<16x32xf32>,
    return
  }
}

</mosaic_0001>

<bundles_post_ra>
// kernel: custom_encoder_layer.1
= control target key start
LH: loop header
LB: loop body
LE: loop exit
PB: predicated region body
PF: predicated region fallthrough
CT: control target
= control target key end

     0   :  { %8 = vsyncpa [#allocation3], 0  ;;  %s1410_s12 = smov [#allocation2]   ;;  %s1697_s0 = inlined_call_operand.vmem [shape: f32[16,32], index: 0, kind: input, shape index: {}, may-alias: {0,3}]   ;;  %s1698_s1 = inlined_call_operand.vmem [shape: f32[1,64], index: 1, kind: input, shape index: {}]   ;;  %s1699_s2 = inlined_call_operand.hbm [shape: f32[168,128], index: 2, kind: input, shape index: {}]   ;;  %s1700_s3 = inlined_call_operand.vmem [shape: f32[16,32], index: 3, kind: output, shape index: {}, may-alias: {0,3}]  }
   0x1   :  { %s18_s13 = sshll.u32 %s1410_s12, 4  ;;  %s1386_s16 = scalar_lea.hbm %s1699_s2, 2688  ;;  %s19_s13 = int_to_ptr.vmem [resolvable:$true] %s18_s13 }
   0x2   :  { %p1387_p0 = scmp.ne.s32.totalorder %s1699_s2, %s1386_s16  ;;  %p1390_p1 = scmp.lt.u32.totalorder %s1386_s16, %s1699_s2 }
   0x4   :  { %p1392_p2 = pnand %p1390_p1, %p1387_p0 }
   0x6   :  { %1395 = shalt.err (!%p1392_p2)
}
   0x7   :  { %s1396_s21 = scalar_lea.vmem %s19_s13, 2688  ;;  %p1401_p4 = scmp.lt.s32.totalorder %s19_s13, %s19_s13 }
   0x8   :  { %p1397_p3 = scmp.ne.s32.totalorder %s19_s13, %s1396_s21  ;;  %p1402_p5 = scmp.lt.s32.totalorder %s1396_s21, %s1396_s21 }
   0xa   :  { %p1403_p6 = por %p1402_p5, %p1401_p4 }
   0xc   :  { %p1404_p7 = pnand %p1403_p6, %p1397_p3 }
   0xe   :  { %1407 = shalt.err (!%p1404_p7)
}
   0xf   :  { %s1411_s22 = smov 128   ;;  %s1412_s23 = smov 8  }
  0x10   :  { %24 = dma.hbm_to_vmem [thread:$0]  %s1699_s2, 2688, %s19_s13, [#allocation3], %s1411_s22, %s1411_s22, %s1412_s23  }
  0x11   :  { %1408 = dma.done.wait [#allocation3], 2688  }
  0x12   :  { %1409 = vsyncadd [#allocation3], 4294964608  ;;  %vm62_vm0 = vcmask 261120   ;;  %v30_v0 = vld [vmem:[#allocation2] sm:$0xff]  ;;  %v31_v1 = vld [vmem:[#allocation2 + $0x8] sm:$0xff]  ;;  %vm174_vm1 = vcmask 64512   ;;  %v312_v40 = vlaneseq }
  0x13   :  { %v32_v2 = vld [vmem:[#allocation2 + $0x10] sm:$0xff]  ;;  %v1216_v3 = vpack.c.bf16 %v31_v1, %v30_v0  ;;  %v33_v4 = vld [vmem:[#allocation2 + $0x18] sm:$0xff]  ;;  %v1456_v5 = vld [vmem:[%s1697_s0] sm:$0xff]  ;;  %s1413_s29 = smov 112   ;;  %s1414_s30 = smov 120   ;;  %vm388_vm13 = vcmask 523264  }
  0x14   :  { %v1220_v6 = vpack.c.bf16 %v33_v4, %v32_v2  ;;  %1116 = vmatprep.mubr.msk.f32.mxu0 %vm62_vm0, %v1456_v5  ;;  %v1463_v7 = vld [vmem:[%s1697_s0 + $0x8] sm:$0xff]  ;;  %v1007_v8 = vld [vmem:[#allocation2 + $0xa0] ss:$0 sm:$0xff]  ;;  %s1415_s4 = smov 104   ;;  %s1416_s0 = smov 96   ;;  %vm1482_vm2 = vmpackc.low %vm174_vm1, %vm174_vm1  ;;  %v313_v41 = vshrl.u32 %v312_v40, 7 }
  0x15   :  { %1217 = vmatprep.subr.bf16.mxu0 %v1216_v3  ;;  %v322_v43 = vand.u32 127, %v312_v40  ;;  %v1026_v0 = vld [vmem:[%s1698_s1] ss:$0 sm:$0xff]  ;;  %s1417_s1 = smov 64   ;;  %s1418_s7 = smov 16  }
  0x16   :  { %1219 = vmatpush3.bf16.msra.mxu0 %v1216_v3  ;;  %v314_v42 = vadd.s32 8, %v313_v41  ;;  %v316_v48 = vadd.s32 24, %v313_v41  ;;  %v323_v49 = vshra.s32 %v313_v41, 4  ;;  %v340_v50 = vand.u32 1, %v313_v41  ;;  %s1419_s8 = smov 24  }
  0x17   :  { %1221 = vmatprep.subr.bf16.mxu0 %v1220_v6  ;;  %v331_v45 = vshra.s32 %v322_v43, 4  ;;  %v348_v47 = vand.u32 1, %v322_v43  ;;  %v315_v51 = vadd.s32 16, %v313_v41  ;;  %v318_v53 = vadd.s32 40, %v313_v41 }
  0x18   :  { %v324_v44 = vshra.s32 %v314_v42, 4  ;;  %v341_v46 = vand.u32 1, %v314_v42  ;;  %v326_v55 = vshra.s32 %v316_v48, 4  ;;  %v343_v56 = vand.u32 1, %v316_v48 }
  0x19   :  { %v317_v57 = vadd.s32 32, %v313_v41  ;;  %vm1517_vm5 = vcmp.eq.s32.totalorder %v323_v49, %v331_v45  ;;  %vm1521_vm6 = vcmp.eq.s32.totalorder %v340_v50, %v348_v47  ;;  %v325_v60 = vshra.s32 %v315_v51, 4 }
  0x1a   :  { %1223 = vmatpush3.bf16.msra.mxu0 %v1220_v6  ;;  %vm1509_vm3 = vcmp.eq.s32.totalorder %v324_v44, %v331_v45  ;;  %vm1513_vm4 = vcmp.eq.s32.totalorder %v341_v46, %v348_v47  ;;  %v342_v61 = vand.u32 1, %v315_v51  ;;  %v328_v62 = vshra.s32 %v318_v53, 4  ;;  %vm357_vm8 = vmand %vm1517_vm5, %vm1521_vm6 }
  0x1b   :  { %vm358_vm7 = vmand %vm1509_vm3, %vm1513_vm4  ;;  %v345_v63 = vand.u32 1, %v318_v53  ;;  %vm1536_vm9 = vcmp.eq.s32.totalorder %v326_v55, %v331_v45  ;;  %vm1540_vm10 = vcmp.eq.s32.totalorder %v343_v56, %v348_v47  ;;  %v327_v3 = vshra.s32 %v317_v57, 4 }
  0x1c   :  { %v320_v4 = vadd.s32 56, %v313_v41  ;;  %vm1544_vm11 = vcmp.eq.s32.totalorder %v325_v60, %v331_v45  ;;  %vm1548_vm12 = vcmp.eq.s32.totalorder %v342_v61, %v348_v47  ;;  %vm360_vm14 = vmand %vm1536_vm9, %vm1540_vm10  ;;  %vm1556_vm15 = vcmp.eq.s32.totalorder %v328_v62, %v331_v45 }
  0x1d   :  { %1117 = vmatmul.mubr.msk.f32.vlgmr.msra.gmra.mrb[0].mxu0 %vm62_vm0, %v1463_v7  ;;  %vm359_vm3 = vmand %vm1544_vm11, %vm1548_vm12  ;;  %vm1568_vm4 = vcmp.eq.s32.totalorder %v327_v3, %v331_v45 }
  0xf0   :  { %v1118_v9 = vpop.f32.mrb[0].mxu0 }
  0xf1   :  { %v135_v10 = vpop.f32.mrb[1].mxu0  ;;  %v141_v12 = vadd.f32 %v1118_v9, %v1007_v8 }
  0xf2   :  { %v136_v11 = vadd.f32 %v1007_v8, %v135_v10  ;;  %v344_v10 = vand.u32 1, %v317_v57 }
  0xf4   :  { %150 = vrot.lane.b32.xlu1 %v136_v11, %s1413_s29  ;;  %146 = vrot.lane.b32.xlu0 %v136_v11, %s1414_s30  ;;  %v1468_v13 = vpack.i.bf16 %v141_v12, %v136_v11  ;;  %vm1573_vm5 = vcmp.eq.s32.totalorder %v344_v10, %v348_v47 }
  0xf5   :  { %1135 = vmatprep.mubr.msk.f32.mxu1 %vm174_vm1, %v136_v11 }
  0xf8   :  { %152 = vrot.lane.b32.xlu1 %v141_v12, %s1413_s29  ;;  %148 = vrot.lane.b32.xlu0 %v141_v12, %s1414_s30 }
  0xfc   :  { %156 = vrot.lane.b32.xlu1 %v141_v12, %s1415_s4  ;;  %154 = vrot.lane.b32.xlu0 %v136_v11, %s1415_s4  ;;  %v319_v11 = vadd.s32 48, %v313_v41 }
 0x100   :  { %1307 = vrot.lane.b32.xlu0 %v1468_v13, %s1416_s0 }
 0x166   :  { %v151_v14 = vpop.permute.xlu1 %150  ;;  %v147_v15 = vpop.permute.xlu0 %146 }
 0x16a   :  { %v153_v16 = vpop.permute.xlu1 %152  ;;  %v149_v17 = vpop.permute.xlu0 %148 }
 0x16b   :  { %v1471_v18 = vpack.i.bf16 %v153_v16, %v151_v14  ;;  %v1473_v19 = vpack.i.bf16 %v149_v17, %v147_v15 }
 0x16d   :  { %1317 = vrot.lane.b32.xlu0 %v1471_v18, %s1416_s0  ;;  %1312 = vrot.lane.b32.xlu1 %v1473_v19, %s1416_s0 }
 0x16e   :  { %v157_v20 = vpop.permute.xlu1 %156  ;;  %v155_v21 = vpop.permute.xlu0 %154 }
 0x16f   :  { %v1477_v22 = vpack.i.bf16 %v157_v20, %v155_v21 }
 0x171   :  { %1322 = vrot.lane.b32.xlu1 %v1477_v22, %s1416_s0 }
 0x172   :  { %v1308_v23 = vpop.permute.xlu0 %1307 }
 0x173   :  { %v1310_v24 = vunpack.i.h.bf16 %v1308_v23  ;;  %v1309_v25 = vunpack.i.l.bf16 %v1308_v23 }
 0x175   :  { %v1224_v27 = vpack.c.bf16 %v1310_v24, %v1309_v25  ;;  %v330_v24 = vshra.s32 %v320_v4, 4  ;;  %v347_v25 = vand.u32 1, %v320_v4 }
 0x177   :  { %1226 = vmatprep.subr.msk.bf16.mxu1 %vm1482_vm2, %v1224_v27  ;;  %vm1595_vm11 = vcmp.eq.s32.totalorder %v347_v25, %v348_v47 }
 0x178   :  { %1229 = vmatpush3.bf16.xpose.msk.msra.mxu1 %vm1482_vm2, %v1224_v27 }
 0x1df   :  { %v1313_v28 = vpop.permute.xlu1 %1312  ;;  %v1318_v29 = vpop.permute.xlu0 %1317 }
 0x1e0   :  { %v1315_v30 = vunpack.i.h.bf16 %v1313_v28  ;;  %v1314_v31 = vunpack.i.l.bf16 %v1313_v28  ;;  %v1320_v32 = vunpack.i.h.bf16 %v1318_v29  ;;  %v1319_v33 = vunpack.i.l.bf16 %v1318_v29 }
 0x1e1   :  { %v329_v29 = vshra.s32 %v319_v11, 4 }
 0x1e2   :  { %v1230_v34 = vpack.c.bf16 %v1315_v30, %v1314_v31  ;;  %v1236_v35 = vpack.c.bf16 %v1320_v32, %v1319_v33  ;;  %v346_v30 = vand.u32 1, %v319_v11 }
 0x1e3   :  { %v1323_v36 = vpop.permute.xlu1 %1322  ;;  %vm1599_vm9 = vcmp.eq.s32.totalorder %v329_v29, %v331_v45 }
 0x1e4   :  { %1232 = vmatprep.subr.msk.bf16.mxu1 %vm1482_vm2, %v1230_v34  ;;  %v1325_v37 = vunpack.i.h.bf16 %v1323_v36  ;;  %v1324_v38 = vunpack.i.l.bf16 %v1323_v36  ;;  %vm1603_vm10 = vcmp.eq.s32.totalorder %v346_v30, %v348_v47 }
 0x1e5   :  { %1235 = vmatpush3.bf16.xpose.msk.msra.mxu1 %vm1482_vm2, %v1230_v34 }
 0x1e6   :  { %1238 = vmatprep.subr.msk.bf16.mxu1 %vm1482_vm2, %v1236_v35  ;;  %v1242_v39 = vpack.c.bf16 %v1325_v37, %v1324_v38 }
 0x1ed   :  { %1241 = vmatpush3.bf16.xpose.msk.msra.mxu1 %vm1482_vm2, %v1236_v35 }
 0x1ee   :  { %1244 = vmatprep.subr.msk.bf16.mxu1 %vm1482_vm2, %v1242_v39 }
 0x1f5   :  { %1247 = vmatpush3.bf16.xpose.msk.msra.mxu1 %vm1482_vm2, %v1242_v39  ;;  %vm1560_vm2 = vcmp.eq.s32.totalorder %v345_v63, %v348_v47 }
 0x1f6   :  { %vm362_vm6 = vmand %vm1556_vm15, %vm1560_vm2  ;;  %vm656_vm15 = vcmask 130048   ;;  %vm659_vm2 = vcmask 195584  }
 0x1fc   :  { %1136 = vmatmul.mubr.msk.f32.vlgmr.msra.gmra.mrb[0].mxu1 %vm174_vm1, %v141_v12 }
 0x1fd   :  { %1138 = vmatprep.mubr.msk.f32.mxu1 %vm174_vm1, %v147_v15 }
 0x200   :  { %1139 = vmatmul.mubr.msk.f32.gmra.mrb[2].mxu1 %vm174_vm1, %v149_v17 }
 0x201   :  { %1141 = vmatprep.mubr.msk.f32.mxu1 %vm174_vm1, %v151_v14 }
 0x204   :  { %1142 = vmatmul.mubr.msk.f32.gmra.mrb[4].mxu1 %vm174_vm1, %v153_v16 }
 0x205   :  { %1144 = vmatprep.mubr.msk.f32.mxu1 %vm174_vm1, %v155_v21 }
 0x208   :  { %1145 = vmatmul.mubr.msk.f32.gmra.mrb[6].mxu1 %vm174_vm1, %v157_v20 }
 0x2cf   :  { %v1137_v6 = vpop.f32.mrb[0].mxu1 }
 0x2d0   :  { %v366_v12 = vsel %vm358_vm7, %v1137_v6, -1e+09  ;;  %v273_v14 = vpop.f32.mrb[1].mxu1  ;;  %vm361_vm7 = vmand %vm1568_vm4, %vm1573_vm5 }
 0x2d1   :  { %v381_v15 = vadd.f32 %v1026_v0, %v366_v12  ;;  %v365_v16 = vsel %vm357_vm8, %v273_v14, -1e+09  ;;  %vm1591_vm8 = vcmp.eq.s32.totalorder %v330_v24, %v331_v45 }
 0x2d2   :  { %v380_v21 = vadd.f32 %v1026_v0, %v365_v16  ;;  %vm364_vm12 = vmand %vm1591_vm8, %vm1595_vm11 }
 0x2d3   :  { %v1140_v26 = vpop.f32.mrb[2].mxu1  ;;  %v392_v27 = vsel %vm388_vm13, %v381_v15, -inf }
 0x2d4   :  { %393 = vmax.xlane.f32.xlu1 %v392_v27  ;;  %v283_v31 = vpop.f32.mrb[3].mxu1  ;;  %v389_v32 = vsel %vm388_vm13, %v380_v21, -inf  ;;  %v368_v33 = vsel %vm360_vm14, %v1140_v26, -1e+09  ;;  %vm363_vm14 = vmand %vm1599_vm9, %vm1603_vm10 }
 0x2d5   :  { %v367_v34 = vsel %vm359_vm3, %v283_v31, -1e+09  ;;  %390 = vmax.xlane.f32.xlu0 %v389_v32  ;;  %v383_v41 = vadd.f32 %v1026_v0, %v368_v33 }
 0x2d6   :  { %v382_v35 = vadd.f32 %v1026_v0, %v367_v34 }
 0x2d7   :  { %v1143_v38 = vpop.f32.mrb[4].mxu1  ;;  %v398_v50 = vsel %vm388_vm13, %v383_v41, -inf }
 0x2d8   :  { %v293_v42 = vpop.f32.mrb[5].mxu1  ;;  %v395_v43 = vsel %vm388_vm13, %v382_v35, -inf  ;;  %v370_v44 = vsel %vm362_vm6, %v1143_v38, -1e+09 }
 0x2d9   :  { %v369_v46 = vsel %vm361_vm7, %v293_v42, -1e+09  ;;  %396 = vmax.xlane.f32.xlu0 %v395_v43  ;;  %v385_v48 = vadd.f32 %v1026_v0, %v370_v44 }
 0x2da   :  { %v384_v45 = vadd.f32 %v1026_v0, %v369_v46 }
 0x2db   :  { %v1146_v47 = vpop.f32.mrb[6].mxu1  ;;  %v404_v56 = vsel %vm388_vm13, %v385_v48, -inf }
 0x2dc   :  { %v303_v49 = vpop.f32.mrb[7].mxu1  ;;  %v401_v51 = vsel %vm388_vm13, %v384_v45, -inf  ;;  %v372_v52 = vsel %vm364_vm12, %v1146_v47, -1e+09 }
 0x2dd   :  { %v371_v53 = vsel %vm363_vm14, %v303_v49, -1e+09  ;;  %399 = vmax.xlane.f32.xlu0 %v398_v50  ;;  %402 = vmax.xlane.f32.xlu1 %v401_v51  ;;  %v387_v55 = vadd.f32 %v1026_v0, %v372_v52 }
 0x2de   :  { %v386_v54 = vadd.f32 %v1026_v0, %v371_v53 }
 0x2df   :  { %v410_v58 = vsel %vm388_vm13, %v387_v55, -inf }
 0x2e0   :  { %v407_v57 = vsel %vm388_vm13, %v386_v54, -inf }
 0x2e1   :  { %405 = vmax.xlane.f32.xlu0 %v404_v56  ;;  %408 = vmax.xlane.f32.xlu1 %v407_v57 }
 0x2e5   :  { %411 = vmax.xlane.f32.xlu0 %v410_v58 }
 0x2f2   :  { %1327 = vrot.lane.b32.xlu1 %v1468_v13, %s1417_s1 }
 0x361   :  { %v394_v59 = vpop.xlane.xlu1 %393 }
 0x362   :  { %v414_v60 = vsub.f32 %v381_v15, %v394_v59  ;;  %v391_v61 = vpop.xlane.xlu0 %390 }
 0x363   :  { %v413_v62 = vsub.f32 %v380_v21, %v391_v61 }
 0x364   :  { %v423_v63 = vmul.f32 1.442695, %v414_v60 }
 0x365   :  { %v421_v1 = vmul.f32 1.442695, %v413_v62 }
 0x366   :  { %1346 = vpow2.f32 %v423_v63  ;;  %v397_v0 = vpop.xlane.xlu0 %396 }
 0x367   :  { %1348 = vpow2.f32 %v421_v1  ;;  %v415_v2 = vsub.f32 %v382_v35, %v397_v0 }
 0x369   :  { %v425_v3 = vmul.f32 1.442695, %v415_v2 }
 0x36a   :  { %v400_v4 = vpop.xlane.xlu0 %399  ;;  %v403_v6 = vpop.xlane.xlu1 %402 }
 0x36b   :  { %1350 = vpow2.f32 %v425_v3  ;;  %v416_v8 = vsub.f32 %v383_v41, %v400_v4  ;;  %v417_v9 = vsub.f32 %v384_v45, %v403_v6 }
 0x36d   :  { %v427_v10 = vmul.f32 1.442695, %v416_v8  ;;  %v429_v11 = vmul.f32 1.442695, %v417_v9 }
 0x36e   :  { %v406_v12 = vpop.xlane.xlu0 %405  ;;  %v409_v13 = vpop.xlane.xlu1 %408 }
 0x36f   :  { %1352 = vpow2.f32 %v427_v10  ;;  %v418_v14 = vsub.f32 %v385_v48, %v406_v12  ;;  %v419_v20 = vsub.f32 %v386_v54, %v409_v13 }
 0x370   :  { %v1623_v15 = vpop.eup %1346  ;;  %1354 = vpow2.f32 %v429_v11 }
 0x371   :  { %v1349_v16 = vpop.eup %1348  ;;  %v431_v17 = vmul.f32 1.442695, %v418_v14  ;;  %v440_v21 = vsel %vm388_vm13, %v1623_v15, 0.0  ;;  %v433_v30 = vmul.f32 1.442695, %v419_v20  ;;  %v36_v20 = vld [vmem:[#allocation2 + $0x30] sm:$0xff] }
 0x372   :  { %441 = vadd.xlane.f32.xlu0 %v440_v21  ;;  %v412_v23 = vpop.xlane.xlu0 %411  ;;  %v1328_v24 = vpop.permute.xlu1 %1327  ;;  %v437_v25 = vsel %vm388_vm13, %v1349_v16, 0.0  ;;  %v37_v21 = vld [vmem:[#allocation2 + $0x38] sm:$0xff] }
 0x373   :  { %1356 = vpow2.f32 %v431_v17  ;;  %v420_v26 = vsub.f32 %v387_v55, %v412_v23  ;;  %v1330_v27 = vunpack.i.h.bf16 %v1328_v24  ;;  %v1329_v28 = vunpack.i.l.bf16 %v1328_v24  ;;  %438 = vadd.xlane.f32.xlu1 %v437_v25 }
 0x374   :  { %v1268_v23 = vpack.c.bf16 %v37_v21, %v36_v20  ;;  %v1038_v20 = vld [vmem:[#allocation2 + $0xa4] ss:$0 sm:$0xff] }
 0x375   :  { %v1628_v29 = vpop.eup %1350  ;;  %v435_v31 = vmul.f32 1.442695, %v420_v26  ;;  %v1248_v32 = vpack.c.bf16 %v1330_v27, %v1329_v28 }
 0x376   :  { %v443_v33 = vsel %vm388_vm13, %v1628_v29, 0.0 }
 0x377   :  { %1358 = vpow2.f32 %v435_v31  ;;  %444 = vadd.xlane.f32.xlu1 %v443_v33  ;;  %1249 = vmatprep.subr.bf16.mxu0 %v1248_v32 }
 0x378   :  { %1251 = vmatpush3.bf16.msra.mxu0 %v1248_v32  ;;  %1360 = vpow2.f32 %v433_v30 }
 0x379   :  { %v1632_v34 = vpop.eup %1352 }
 0x37a   :  { %v1634_v35 = vpop.eup %1354  ;;  %v446_v36 = vsel %vm388_vm13, %v1632_v34, 0.0 }
 0x37b   :  { %447 = vadd.xlane.f32.xlu0 %v446_v36  ;;  %v449_v37 = vsel %vm388_vm13, %v1634_v35, 0.0 }
 0x37c   :  { %450 = vadd.xlane.f32.xlu1 %v449_v37 }
 0x37d   :  { %v1640_v38 = vpop.eup %1356 }
 0x37e   :  { %v452_v39 = vsel %vm388_vm13, %v1640_v38, 0.0 }
 0x37f   :  { %453 = vadd.xlane.f32.xlu0 %v452_v39 }
 0x381   :  { %v1644_v40 = vpop.eup %1358 }
 0x382   :  { %v458_v41 = vsel %vm388_vm13, %v1644_v40, 0.0  ;;  %v1361_v42 = vpop.eup %1360 }
 0x383   :  { %459 = vadd.xlane.f32.xlu0 %v458_v41  ;;  %v455_v43 = vsel %vm388_vm13, %v1361_v42, 0.0 }
 0x387   :  { %456 = vadd.xlane.f32.xlu0 %v455_v43 }
 0x38d   :  { %1337 = vrot.lane.b32.xlu1 %v1471_v18, %s1417_s1 }
 0x391   :  { %1342 = vrot.lane.b32.xlu1 %v1477_v22, %s1417_s1 }
 0x39d   :  { %1332 = vrot.lane.b32.xlu0 %v1473_v19, %s1417_s1 }
 0x3ff   :  { %v442_v46 = vpop.xlane.xlu0 %441 }
 0x400   :  { %v439_v44 = vpop.xlane.xlu1 %438 }
 0x401   :  { %1362 = vrcp.f32 %v439_v44  ;;  %v1035_v44 = vld [vmem:[#allocation2 + $0xa2] ss:$0 sm:$0xff] }
 0x402   :  { %1364 = vrcp.f32 %v442_v46 }
 0x404   :  { %v445_v45 = vpop.xlane.xlu1 %444 }
 0x405   :  { %1366 = vrcp.f32 %v445_v45 }
 0x408   :  { %v448_v47 = vpop.xlane.xlu0 %447 }
 0x409   :  { %v451_v51 = vpop.xlane.xlu1 %450  ;;  %1368 = vrcp.f32 %v448_v47 }
 0x40a   :  { %1370 = vrcp.f32 %v451_v51 }
 0x40b   :  { %v1363_v48 = vpop.eup %1362 }
 0x40c   :  { %v454_v49 = vpop.xlane.xlu0 %453  ;;  %v462_v50 = vmul.f32 %v1363_v48, %v1349_v16  ;;  %v1365_v63 = vpop.eup %1364  ;;  %v35_v16 = vld [vmem:[#allocation2 + $0x28] sm:$0xff] }
 0x40d   :  { %v1338_v53 = vpop.permute.xlu1 %1337  ;;  %1372 = vrcp.f32 %v454_v49  ;;  %v464_v0 = vmul.f32 %v1365_v63, %v1623_v15  ;;  %v34_v15 = vld [vmem:[#allocation2 + $0x20] sm:$0xff] }
 0x40e   :  { %1163 = vmatprep.mubr.msk.f32.mxu0 %vm388_vm13, %v462_v50  ;;  %v1340_v55 = vunpack.i.h.bf16 %v1338_v53  ;;  %v1339_v22 = vunpack.i.l.bf16 %v1338_v53  ;;  %v1264_v17 = vpack.c.bf16 %v35_v16, %v34_v15 }
 0x40f   :  { %v1367_v1 = vpop.eup %1366 }
 0x410   :  { %v460_v52 = vpop.xlane.xlu0 %459  ;;  %v1256_v59 = vpack.c.bf16 %v1340_v55, %v1339_v22  ;;  %v466_v3 = vmul.f32 %v1367_v1, %v1628_v29  ;;  %v42_v1 = vld [vmem:[#allocation2 + $0x60] sm:$0xff] }
 0x411   :  { %v1343_v19 = vpop.permute.xlu1 %1342 }
 0x412   :  { %v1345_v60 = vunpack.i.h.bf16 %v1343_v19  ;;  %v1344_v61 = vunpack.i.l.bf16 %v1343_v19 }
 0x413   :  { %v1369_v2 = vpop.eup %1368 }
 0x414   :  { %v457_v18 = vpop.xlane.xlu0 %456  ;;  %v1260_v62 = vpack.c.bf16 %v1345_v60, %v1344_v61  ;;  %v1371_v4 = vpop.eup %1370  ;;  %v468_v6 = vmul.f32 %v1369_v2, %v1632_v34  ;;  %v40_v61 = vld [vmem:[#allocation2 + $0x50] sm:$0xff] }
 0x415   :  { %1374 = vrcp.f32 %v457_v18  ;;  %v470_v9 = vmul.f32 %v1371_v4, %v1634_v35  ;;  %v44_v2 = vld [vmem:[#allocation2 + $0x70] sm:$0xff]  ;;  %v45_v4 = vld [vmem:[#allocation2 + $0x78] sm:$0xff] }
 0x416   :  { %1376 = vrcp.f32 %v460_v52 }
 0x417   :  { %v1373_v8 = vpop.eup %1372 }
 0x418   :  { %v1333_v54 = vpop.permute.xlu0 %1332  ;;  %v472_v11 = vmul.f32 %v1373_v8, %v1640_v38  ;;  %v46_v8 = vld [vmem:[#allocation2 + $0x80] sm:$0xff] }
 0x419   :  { %v1335_v56 = vunpack.i.h.bf16 %v1333_v54  ;;  %v1334_v57 = vunpack.i.l.bf16 %v1333_v54 }
 0x41b   :  { %v1252_v58 = vpack.c.bf16 %v1335_v56, %v1334_v57 }
 0x41d   :  { %1253 = vmatprep.subr.bf16.mxu0 %v1252_v58 }
 0x41e   :  { %1255 = vmatpush3.bf16.msra.mxu0 %v1252_v58 }
 0x41f   :  { %1257 = vmatprep.subr.bf16.mxu0 %v1256_v59  ;;  %v1375_v10 = vpop.eup %1374 }
 0x420   :  { %v1377_v12 = vpop.eup %1376  ;;  %v474_v13 = vmul.f32 %v1375_v10, %v1361_v42 }
 0x421   :  { %v476_v14 = vmul.f32 %v1377_v12, %v1644_v40 }
 0x422   :  { %1259 = vmatpush3.bf16.msra.mxu0 %v1256_v59  ;;  %v39_v59 = vld [vmem:[#allocation2 + $0x48] sm:$0xff] }
 0x423   :  { %1261 = vmatprep.subr.bf16.mxu0 %v1260_v62 }
 0x426   :  { %1263 = vmatpush3.bf16.msra.mxu0 %v1260_v62  ;;  %v41_v62 = vld [vmem:[#allocation2 + $0x58] sm:$0xff] }
 0x427   :  { %1265 = vmatprep.subr.bf16.mxu0 %v1264_v17  ;;  %v1276_v63 = vpack.c.bf16 %v41_v62, %v40_v61  ;;  %v1046_v61 = vld [vmem:[#allocation2 + $0xa6] ss:$0 sm:$0xff] }
 0x429   :  { %1164 = vmatmul.mubr.msk.f32.vlgmr.msra.gmra.mrb[2].mxu0 %vm388_vm13, %v464_v0  ;;  %v43_v0 = vld [vmem:[#allocation2 + $0x68] sm:$0xff] }
 0x42a   :  { %1166 = vmatprep.mubr.msk.f32.mxu0 %vm388_vm13, %v466_v3  ;;  %1267 = vmatpush3.bf16.msra.mxu0 %v1264_v17  ;;  %v1280_v3 = vpack.c.bf16 %v43_v0, %v42_v1  ;;  %v1047_v1 = vld [vmem:[#allocation2 + $0xa7] ss:$0 sm:$0xff] }
 0x42b   :  { %1269 = vmatprep.subr.bf16.mxu0 %v1268_v23 }
 0x42c   :  { %1281 = vmatprep.subr.bf16.mxu1 %v1280_v3 }
 0x42d   :  { %1167 = vmatmul.mubr.msk.f32.gmra.mrb[4].mxu0 %vm388_vm13, %v468_v6  ;;  %v1284_v6 = vpack.c.bf16 %v45_v4, %v44_v2  ;;  %1283 = vmatpush3.bf16.msra.mxu1 %v1280_v3 }
 0x42e   :  { %1169 = vmatprep.mubr.msk.f32.mxu0 %vm388_vm13, %v470_v9  ;;  %1271 = vmatpush3.bf16.msra.mxu0 %v1268_v23  ;;  %v47_v9 = vld [vmem:[#allocation2 + $0x88] sm:$0xff]  ;;  %v1039_v23 = vld [vmem:[#allocation2 + $0xa5] ss:$0 sm:$0xff] }
 0x42f   :  { %1285 = vmatprep.subr.bf16.mxu1 %v1284_v6  ;;  %v1288_v10 = vpack.c.bf16 %v47_v9, %v46_v8 }
 0x431   :  { %1170 = vmatmul.mubr.msk.f32.gmra.mrb[6].mxu0 %vm388_vm13, %v472_v11  ;;  %1287 = vmatpush3.bf16.msra.mxu1 %v1284_v6 }
 0x432   :  { %1172 = vmatprep.mubr.msk.f32.mxu0 %vm388_vm13, %v474_v13  ;;  %1289 = vmatprep.subr.bf16.mxu1 %v1288_v10 }
 0x435   :  { %1173 = vmatmul.mubr.msk.f32.gmra.mrb[8].mxu0 %vm388_vm13, %v476_v14  ;;  %1291 = vmatpush3.bf16.msra.mxu1 %v1288_v10 }
 0x4fc   :  { %v1165_v24 = vpop.f32.mrb[2].mxu0 }
 0x4fd   :  { %v591_v25 = vpop.f32.mrb[3].mxu0 }
 0x500   :  { %v1168_v26 = vpop.f32.mrb[4].mxu0 }
 0x501   :  { %634 = vrot.lane.b32.xlu1 %v1168_v26, %s1412_s23  ;;  %v601_v27 = vpop.f32.mrb[5].mxu0 }
 0x504   :  { %v1171_v28 = vpop.f32.mrb[6].mxu0 }
 0x505   :  { %632 = vrot.lane.b32.xlu1 %v601_v27, %s1412_s23  ;;  %v611_v29 = vpop.f32.mrb[7].mxu0 }
 0x506   :  { %640 = vrot.lane.b32.xlu0 %v611_v29, %s1418_s7 }
 0x508   :  { %v1174_v30 = vpop.f32.mrb[8].mxu0 }
 0x509   :  { %642 = vrot.lane.b32.xlu1 %v1171_v28, %s1418_s7  ;;  %v621_v31 = vpop.f32.mrb[9].mxu0 }
 0x50a   :  { %648 = vrot.lane.b32.xlu0 %v621_v31, %s1419_s8  ;;  %v49_v31 = vld [vmem:[#allocation2 + $0x98] sm:$0xff] }
 0x50d   :  { %650 = vrot.lane.b32.xlu1 %v1174_v30, %s1419_s8  ;;  %v48_v30 = vld [vmem:[#allocation2 + $0x90] sm:$0xff] }
 0x573   :  { %v635_v32 = vpop.permute.xlu1 %634 }
 0x574   :  { %v655_v40 = vsel %vm174_vm1, %v1165_v24, %v635_v32  ;;  %v1292_v32 = vpack.c.bf16 %v49_v31, %v48_v30 }
 0x576   :  { %1293 = vmatprep.subr.bf16.mxu1 %v1292_v32 }
 0x577   :  { %v633_v33 = vpop.permute.xlu1 %632  ;;  %1295 = vmatpush3.bf16.msra.mxu1 %v1292_v32 }
 0x578   :  { %v641_v34 = vpop.permute.xlu0 %640  ;;  %v654_v35 = vsel %vm174_vm1, %v591_v25, %v633_v33  ;;  %v1040_v33 = vld [vmem:[#allocation2 + $0xa1] ss:$0 sm:$0xff] }
 0x579   :  { %v657_v37 = vsel %vm656_vm15, %v654_v35, %v641_v34 }
 0x57b   :  { %v643_v36 = vpop.permute.xlu1 %642 }
 0x57c   :  { %v649_v38 = vpop.permute.xlu0 %648  ;;  %v658_v41 = vsel %vm656_vm15, %v655_v40, %v643_v36  ;;  %v1043_v40 = vld [vmem:[#allocation2 + $0xa3] ss:$0 sm:$0xff] }
 0x57d   :  { %v660_v39 = vsel %vm659_vm2, %v657_v37, %v649_v38 }
 0x57e   :  { %1183 = vmatprep.mubr.msk.f32.mxu0 %vm62_vm0, %v660_v39 }
 0x57f   :  { %v651_v42 = vpop.permute.xlu1 %650 }
 0x580   :  { %v661_v43 = vsel %vm659_vm2, %v658_v41, %v651_v42 }
 0x581   :  { %1184 = vmatmul.mubr.msk.f32.vlgmr.msra.gmra.mrb[10].mxu0 %vm62_vm0, %v661_v43 }
 0x654   :  { %v1185_v46 = vpop.f32.mrb[10].mxu0 }
 0x655   :  { %v744_v45 = vadd.f32 %v1185_v46, %v1035_v44  ;;  %v738_v47 = vpop.f32.mrb[11].mxu0 }
 0x656   :  { %v739_v48 = vadd.f32 %v1035_v44, %v738_v47 }
 0x657   :  { %v748_v49 = vadd.f32 %v744_v45, %v1463_v7 }
 0x658   :  { %v747_v50 = vadd.f32 %v739_v48, %v1456_v5  ;;  %v38_v5 = vld [vmem:[#allocation2 + $0x40] sm:$0xff] }
 0x659   :  { %v752_v51 = vsel %vm62_vm0, %v748_v49, 0.0  ;;  %v1272_v60 = vpack.c.bf16 %v39_v59, %v38_v5 }
 0x65a   :  { %753 = vadd.xlane.f32.xlu1 %v752_v51  ;;  %v749_v52 = vsel %vm62_vm0, %v747_v50, 0.0 }
 0x65b   :  { %750 = vadd.xlane.f32.xlu0 %v749_v52  ;;  %1273 = vmatprep.subr.bf16.mxu0 %v1272_v60 }
 0x65c   :  { %1275 = vmatpush3.bf16.msra.mxu0 %v1272_v60 }
 0x65d   :  { %1277 = vmatprep.subr.bf16.mxu0 %v1276_v63 }
 0x660   :  { %1279 = vmatpush3.bf16.msra.mxu0 %v1276_v63 }
 0x6e7   :  { %v754_v53 = vpop.xlane.xlu1 %753 }
 0x6e8   :  { %v757_v18 = vmul.f32 0.03125, %v754_v53  ;;  %v751_v54 = vpop.xlane.xlu0 %750 }
 0x6e9   :  { %v756_v55 = vmul.f32 0.03125, %v751_v54 }
 0x6ea   :  { %v759_v22 = vsub.f32 %v748_v49, %v757_v18 }
 0x6eb   :  { %v758_v56 = vsub.f32 %v747_v50, %v756_v55 }
 0x6ec   :  { %v761_v58 = vmul.f32 %v759_v22, %v759_v22 }
 0x6ed   :  { %v760_v57 = vmul.f32 %v758_v56, %v758_v56 }
 0x6ee   :  { %v765_v7 = vsel %vm62_vm0, %v761_v58, 0.0 }
 0x6ef   :  { %v762_v19 = vsel %vm62_vm0, %v760_v57, 0.0 }
 0x6f0   :  { %763 = vadd.xlane.f32.xlu0 %v762_v19 }
 0x6f4   :  { %766 = vadd.xlane.f32.xlu0 %v765_v7 }
 0x77d   :  { %v764_v11 = vpop.xlane.xlu0 %763 }
 0x77e   :  { %v768_v12 = vmul.f32 0.03125, %v764_v11 }
 0x780   :  { %v770_v13 = vadd.f32 1e-05, %v768_v12 }
 0x781   :  { %v767_v14 = vpop.xlane.xlu0 %766 }
 0x782   :  { %1378 = vrsqrt.f32 %v770_v13  ;;  %v769_v15 = vmul.f32 0.03125, %v767_v14 }
 0x784   :  { %v771_v16 = vadd.f32 1e-05, %v769_v15 }
 0x786   :  { %1380 = vrsqrt.f32 %v771_v16 }
 0x78c   :  { %v1379_v17 = vpop.eup %1378 }
 0x78d   :  { %v774_v21 = vmul.f32 %v1379_v17, %v758_v56 }
 0x78f   :  { %v780_v24 = vmul.f32 %v1038_v20, %v774_v21 }
 0x790   :  { %v1381_v25 = vpop.eup %1380 }
 0x791   :  { %v775_v26 = vmul.f32 %v1381_v25, %v759_v22  ;;  %v786_v27 = vadd.f32 %v1039_v23, %v780_v24 }
 0x793   :  { %v781_v28 = vmul.f32 %v1038_v20, %v775_v26  ;;  %1194 = vmatprep.mubr.msk.f32.mxu0 %vm62_vm0, %v786_v27 }
 0x795   :  { %v787_v29 = vadd.f32 %v1039_v23, %v781_v28 }
 0x797   :  { %1195 = vmatmul.mubr.msk.f32.vlgmr.msra.gmra.mrb[12].mxu0 %vm62_vm0, %v787_v29 }
 0x86a   :  { %v1196_v34 = vpop.f32.mrb[12].mxu0 }
 0x86b   :  { %v870_v35 = vadd.f32 %v1196_v34, %v1040_v33  ;;  %v864_v36 = vpop.f32.mrb[13].mxu0 }
 0x86c   :  { %v865_v37 = vadd.f32 %v1040_v33, %v864_v36 }
 0x86d   :  { %v874_v39 = vmax.f32 %v870_v35, 0.0 }
 0x86e   :  { %v873_v38 = vmax.f32 %v865_v37, 0.0 }
 0x870   :  { %1213 = vmatprep.mubr.msk.f32.mxu1 %vm388_vm13, %v873_v38 }
 0x871   :  { %1214 = vmatmul.mubr.msk.f32.vlgmr.msra.gmra.mrb[8].mxu1 %vm388_vm13, %v874_v39 }
 0x944   :  { %v1215_v41 = vpop.f32.mrb[8].mxu1 }
 0x945   :  { %v957_v42 = vadd.f32 %v1215_v41, %v1043_v40  ;;  %v951_v43 = vpop.f32.mrb[9].mxu1 }
 0x946   :  { %v952_v44 = vadd.f32 %v1043_v40, %v951_v43 }
 0x947   :  { %v961_v46 = vadd.f32 %v957_v42, %v787_v29 }
 0x948   :  { %v960_v45 = vadd.f32 %v952_v44, %v786_v27 }
 0x949   :  { %v965_v47 = vsel %vm62_vm0, %v961_v46, 0.0 }
 0x94a   :  { %966 = vadd.xlane.f32.xlu0 %v965_v47  ;;  %v962_v48 = vsel %vm62_vm0, %v960_v45, 0.0 }
 0x94b   :  { %963 = vadd.xlane.f32.xlu1 %v962_v48 }
 0x9d7   :  { %v967_v49 = vpop.xlane.xlu0 %966 }
 0x9d8   :  { %v969_v50 = vmul.f32 0.03125, %v967_v49  ;;  %v964_v51 = vpop.xlane.xlu1 %963 }
 0x9d9   :  { %v968_v52 = vmul.f32 0.03125, %v964_v51 }
 0x9da   :  { %v971_v53 = vsub.f32 %v961_v46, %v969_v50 }
 0x9db   :  { %v970_v18 = vsub.f32 %v960_v45, %v968_v52 }
 0x9dc   :  { %v973_v54 = vmul.f32 %v971_v53, %v971_v53 }
 0x9dd   :  { %v972_v55 = vmul.f32 %v970_v18, %v970_v18 }
 0x9de   :  { %v977_v22 = vsel %vm62_vm0, %v973_v54, 0.0 }
 0x9df   :  { %978 = vadd.xlane.f32.xlu0 %v977_v22  ;;  %v974_v56 = vsel %vm62_vm0, %v972_v55, 0.0 }
 0x9e0   :  { %975 = vadd.xlane.f32.xlu1 %v974_v56 }
 0xa6c   :  { %v979_v57 = vpop.xlane.xlu0 %978 }
 0xa6d   :  { %v981_v19 = vmul.f32 0.03125, %v979_v57  ;;  %v976_v58 = vpop.xlane.xlu1 %975 }
 0xa6e   :  { %v980_v7 = vmul.f32 0.03125, %v976_v58 }
 0xa6f   :  { %v983_v5 = vadd.f32 1e-05, %v981_v19 }
 0xa70   :  { %v982_v59 = vadd.f32 1e-05, %v980_v7 }
 0xa71   :  { %1382 = vrsqrt.f32 %v983_v5 }
 0xa72   :  { %1384 = vrsqrt.f32 %v982_v59 }
 0xa7b   :  { %v1383_v60 = vpop.eup %1382 }
 0xa7c   :  { %v1385_v62 = vpop.eup %1384  ;;  %v987_v63 = vmul.f32 %v1383_v60, %v971_v53 }
 0xa7d   :  { %v986_v0 = vmul.f32 %v1385_v62, %v970_v18 }
 0xa7e   :  { %v993_v2 = vmul.f32 %v1046_v61, %v987_v63 }
 0xa7f   :  { %v992_v3 = vmul.f32 %v1046_v61, %v986_v0 }
 0xa80   :  { %v999_v4 = vadd.f32 %v1047_v1, %v993_v2 }
 0xa81   :  { %v998_v6 = vadd.f32 %v1047_v1, %v992_v3 }
 0xa82   :  { %1001 = vst.msk [vmem:[%s1700_s3 + $0x8] sm:$0xff] %vm62_vm0, %v999_v4 }
 0xa83   :  { %1000 = vst.msk [vmem:[%s1700_s3] sm:$0xff] %vm62_vm0, %v998_v6 }
 0xa84   :  { %1006 = vsyncpa [#allocation3], 1 }

</bundles_post_ra>
